<compile_context>
chip_gen: v5e
topology: v5e:2x2
jax: 0.10.0
libtpu: 0.0.40
codegen_flags: <defaults>
</compile_context>

<pallas_src>
import jax
import jax.numpy as jnp
from jax.experimental import pallas as pl
from jax.experimental.pallas import tpu as pltpu

EMBEDDING_DIM = 5
HIDDEN = 128
CONTEXT_SIZE = 2           # 2 words left + 2 words right -> 4 context indices
NEG_BIG = -1e30            # finite mask value baked into padded b2 columns

raw_text = ('We are about to study the idea of a computational process.\n'
            'Computational processes are abstract beings that inhabit computers.\n'
            'As they evolve, processes manipulate other abstract things called data.\n'
            'The evolution of a process is directed by a pattern of rules\n'
            'called a program. People create programs to direct processes. In effect,\n'
            'we conjure the spirits of the computer with our spells.').split()

vocab = sorted(set(raw_text))           # sorted for determinism
vocab_size = len(vocab)
word_to_ix = {w: i for i, w in enumerate(vocab)}


def cbow_kernel(counts_ref,                         # VMEM: (tb, V_pad) context counts
                ew1_ref, b1_ref, w2_ref, b2_ref,    # VMEM params (EW1, b1, W2^T, b2+mask)
                out_ref):                           # VMEM: (tb, V_pad) log-probs
    # --- embedding gather+sum + linear1 matmul fused into one MXU op ---------
    #   counts(tb, V_pad) @ EW1(V_pad, H)  ==  sum_i E[idx_i] @ W1^T  per row
    h = jnp.dot(counts_ref[...], ew1_ref[...],
                preferred_element_type=jnp.float32)
    h = jnp.maximum(h + b1_ref[...], 0.0)           # bias + relu, stays in vregs

    # --- linear2 on the MXU: (tb, H) @ (H, V_pad), lane-dense output ---------
    # Padded vocab columns of W2^T are zero and b2 carries -1e30 there, so the
    # padding is already "masked" without any in-kernel iota/select.
    logits = jnp.dot(h, w2_ref[...],
                     preferred_element_type=jnp.float32) + b2_ref[...]

    # --- numerically stable log-softmax over the vocab axis ------------------
    m = jnp.max(logits, axis=-1, keepdims=True)
    lse = jnp.log(jnp.sum(jnp.exp(logits - m), axis=-1, keepdims=True)) + m
    out_ref[...] = logits - lse


def cbow_forward(indices, emb, w1, b1, w2, b2, *, tb=64):
    """Batched CBOW forward. indices: (B, n_ctx) int32 -> (B, V) log-probs."""
    B, _n_ctx = indices.shape
    V, _D = emb.shape
    H = w1.shape[0]
    V_pad = pl.cdiv(V, 128) * 128
    B_pad = pl.cdiv(B, tb) * tb

    # ---- wrapper-side weight folding / layout plumbing (no per-step compute) ----
    ew1 = jnp.pad(jnp.dot(emb, w1.T), ((0, V_pad - V), (0, 0)))           # (V_pad, H)
    w2_t = jnp.pad(w2.T, ((0, 0), (0, V_pad - V)))                        # (H, V_pad)
    b1_row = b1.reshape(1, H).astype(jnp.float32)                         # (1, H)
    b2_row = jnp.pad(b2, (0, V_pad - V),
                     constant_values=NEG_BIG).reshape(1, V_pad)           # (1, V_pad)

    # Context indices -> per-example vocab-count rows (one-hot sum).  Padded
    # batch rows are all-zero counts and are sliced away at the end.
    idx = jnp.pad(indices.astype(jnp.int32), ((0, B_pad - B), (0, 0)))    # (B_pad, n_ctx)
    counts = jax.nn.one_hot(idx, V_pad, dtype=jnp.float32).sum(axis=1)    # (B_pad, V_pad)

    grid_spec = pltpu.PrefetchScalarGridSpec(
        num_scalar_prefetch=0,
        grid=(B_pad // tb,),
        in_specs=[
            pl.BlockSpec((tb, V_pad), lambda g: (g, 0)),     # counts (per batch tile)
            pl.BlockSpec((V_pad, H), lambda g: (0, 0)),      # EW1 (resident)
            pl.BlockSpec((1, H),     lambda g: (0, 0)),      # b1
            pl.BlockSpec((H, V_pad), lambda g: (0, 0)),      # W2^T (resident)
            pl.BlockSpec((1, V_pad), lambda g: (0, 0)),      # b2 (+ padding mask)
        ],
        out_specs=pl.BlockSpec((tb, V_pad), lambda g: (g, 0)),
    )

    out = pl.pallas_call(
        cbow_kernel,
        out_shape=jax.ShapeDtypeStruct((B_pad, V_pad), jnp.float32),
        grid_spec=grid_spec,
        compiler_params=pltpu.CompilerParams(
            dimension_semantics=("parallel",)),              # batch axis -> megacore
    )(counts, ew1, b1_row, w2_t, b2_row)

    return out[:B, :V]


def cbow_reference(indices, emb, w1, b1, w2, b2):
    e = emb[indices]                               # (B, n_ctx, D)
    s = e.sum(axis=1)                              # (B, D)
    h = jnp.maximum(s @ w1.T + b1, 0.0)            # (B, 128)
    out = h @ w2.T + b2                            # (B, V)
    return jax.nn.log_softmax(out, axis=-1)


if __name__ == "__main__":
    key = jax.random.PRNGKey(0)
    k1, k2, k3, k4, k5 = jax.random.split(key, 5)

    # Deterministic synthetic parameters (shapes follow nn.Embedding / nn.Linear).
    emb = jax.random.normal(k1, (vocab_size, EMBEDDING_DIM), jnp.float32)   # Embedding(V, 5)
    w1 = 0.1 * jax.random.normal(k2, (HIDDEN, EMBEDDING_DIM), jnp.float32)  # Linear(5, 128).weight
    b1 = 0.1 * jax.random.normal(k3, (HIDDEN,), jnp.float32)                # Linear(5, 128).bias
    w2 = 0.1 * jax.random.normal(k4, (vocab_size, HIDDEN), jnp.float32)     # Linear(128, V).weight
    b2 = 0.1 * jax.random.normal(k5, (vocab_size,), jnp.float32)            # Linear(128, V).bias

    # All CBOW context windows from the corpus -> batched workload.
    ctx = []
    for i in range(CONTEXT_SIZE, len(raw_text) - CONTEXT_SIZE):
        ctx.append([word_to_ix[raw_text[i - 2]], word_to_ix[raw_text[i - 1]],
                    word_to_ix[raw_text[i + 1]], word_to_ix[raw_text[i + 2]]])
    indices = jnp.array(ctx, dtype=jnp.int32)                               # (58, 4)

    log_probs = jax.block_until_ready(cbow_forward(indices, emb, w1, b1, w2, b2))
    ref = cbow_reference(indices, emb, w1, b1, w2, b2)
    assert log_probs.shape == (indices.shape[0], vocab_size)
    assert jnp.allclose(log_probs, ref, atol=1e-3, rtol=1e-3), "batched mismatch vs reference"

    # Single-example call keeps the original module's (1, V) output semantics.
    single = jax.block_until_ready(cbow_forward(indices[:1], emb, w1, b1, w2, b2))
    assert single.shape == (1, vocab_size)
    assert jnp.allclose(single, ref[:1], atol=1e-3, rtol=1e-3), "single-example mismatch"

    print("KERNEL_OK")
</pallas_src>

<mosaic_0001>
module attributes {stable_mosaic.version = 11 : i64} {
  func.func @cbow_kernel(%arg0: i32, %arg1: memref<64x128xf32, #tpu.memory_space<vmem>>, %arg2: memref<128x128xf32, #tpu.memory_space<vmem>>, %arg3: memref<1x128xf32, #tpu.memory_space<vmem>>, %arg4: memref<128x128xf32, #tpu.memory_space<vmem>>, %arg5: memref<1x128xf32, #tpu.memory_space<vmem>>, %arg6: memref<64x128xf32, #tpu.memory_space<vmem>>) attributes {dimension_semantics = [#tpu.dimension_semantics<parallel>], iteration_bounds = array<i64: 1>, scalar_prefetch = 0 : i64, scratch_operands = 0 : i64, tpu.core_type = #tpu.core_type<tc>, window_params = [{transform_indices = @transform_0, window_bounds = array<i64: 64, 128>}, {pipeline_mode = #tpu.pipeline_mode<synchronous>, transform_indices = @transform_1, window_bounds = array<i64: 128, 128>}, {pipeline_mode = #tpu.pipeline_mode<synchronous>, transform_indices = @transform_2, window_bounds = array<i64: 1, 128>}, {pipeline_mode = #tpu.pipeline_mode<synchronous>, transform_indices = @transform_3, window_bounds = array<i64: 128, 128>}, {pipeline_mode = #tpu.pipeline_mode<synchronous>, transform_indices = @transform_4, window_bounds = array<i64: 1, 128>}, {transform_indices = @transform_5, window_bounds = array<i64: 64, 128>}]} {
    %c0 = arith.constant 0 : index
    %c0_0 = arith.constant 0 : index
    %0 = vector.load %arg1[%c0, %c0_0] : memref<64x128xf32, #tpu.memory_space<vmem>>, vector<64x128xf32>
    %c0_1 = arith.constant 0 : index
    %c0_2 = arith.constant 0 : index
    %1 = vector.load %arg2[%c0_1, %c0_2] : memref<128x128xf32, #tpu.memory_space<vmem>>, vector<128x128xf32>
    %cst = arith.constant dense<0.000000e+00> : vector<64x128xf32>
    %2 = tpu.matmul %0, %1, %cst {dimension_numbers = #tpu.dot_dimension_numbers<[1], [0], [0], [1], [0, 0, 1, 1], [], []>} : vector<64x128xf32>, vector<128x128xf32>, vector<64x128xf32> -> vector<64x128xf32>
    %c0_3 = arith.constant 0 : index
    %c0_4 = arith.constant 0 : index
    %3 = vector.load %arg3[%c0_3, %c0_4] : memref<1x128xf32, #tpu.memory_space<vmem>>, vector<1x128xf32>
    %4 = vector.broadcast %3 : vector<1x128xf32> to vector<64x128xf32>
    %5 = arith.addf %2, %4 : vector<64x128xf32>
    %cst_5 = arith.constant 0.000000e+00 : f32
    %6 = vector.broadcast %cst_5 : f32 to vector<64x128xf32>
    %7 = arith.maximumf %5, %6 : vector<64x128xf32>
    %c0_6 = arith.constant 0 : index
    %c0_7 = arith.constant 0 : index
    %8 = vector.load %arg4[%c0_6, %c0_7] : memref<128x128xf32, #tpu.memory_space<vmem>>, vector<128x128xf32>
    %cst_8 = arith.constant dense<0.000000e+00> : vector<64x128xf32>
    %9 = tpu.matmul %7, %8, %cst_8 {dimension_numbers = #tpu.dot_dimension_numbers<[1], [0], [0], [1], [0, 0, 1, 1], [], []>} : vector<64x128xf32>, vector<128x128xf32>, vector<64x128xf32> -> vector<64x128xf32>
    %c0_9 = arith.constant 0 : index
    %c0_10 = arith.constant 0 : index
    %10 = vector.load %arg5[%c0_9, %c0_10] : memref<1x128xf32, #tpu.memory_space<vmem>>, vector<1x128xf32>
    %11 = vector.broadcast %10 : vector<1x128xf32> to vector<64x128xf32>
    %12 = arith.addf %9, %11 : vector<64x128xf32>
    %cst_11 = arith.constant dense<0xFF800000> : vector<64xf32>
    %13 = vector.multi_reduction <maximumf>, %12, %cst_11 [1] : vector<64x128xf32> to vector<64xf32>
    %14 = vector.shape_cast %13 : vector<64xf32> to vector<64x1xf32>
    %15 = vector.broadcast %14 : vector<64x1xf32> to vector<64x128xf32>
    %16 = arith.subf %12, %15 : vector<64x128xf32>
    %17 = math.exp %16 : vector<64x128xf32>
    %cst_12 = arith.constant dense<0.000000e+00> : vector<64xf32>
    %18 = vector.multi_reduction <add>, %17, %cst_12 [1] : vector<64x128xf32> to vector<64xf32>
    %19 = vector.shape_cast %18 : vector<64xf32> to vector<64x1xf32>
    %20 = math.log %19 : vector<64x1xf32>
    %21 = arith.addf %20, %14 : vector<64x1xf32>
    %22 = vector.broadcast %21 : vector<64x1xf32> to vector<64x128xf32>
    %23 = arith.subf %12, %22 : vector<64x128xf32>
    %c0_13 = arith.constant 0 : index
    %c0_14 = arith.constant 0 : index
    %24 = vector.load %arg6[%c0_13, %c0_14] : memref<64x128xf32, #tpu.memory_space<vmem>>, vector<64x128xf32>
    tpu.vector_store %arg6[%c0_13, %c0_14], %23 {strides = array<i32>} : memref<64x128xf32, #tpu.memory_space<vmem>>, vector<64x128xf32>,
    return
  }
  func.func @transform_0(%arg0: i32) -> (i32, i32) {
    %c0_i32 = arith.constant 0 : i32
    %c0_i32_0 = arith.constant 0 : i32
    return %arg0, %c0_i32 : i32, i32
  }
  func.func @transform_1(%arg0: i32) -> (i32, i32) {
    %c0_i32 = arith.constant 0 : i32
    %c0_i32_0 = arith.constant 0 : i32
    %c0_i32_1 = arith.constant 0 : i32
    return %c0_i32, %c0_i32_0 : i32, i32
  }
  func.func @transform_2(%arg0: i32) -> (i32, i32) {
    %c0_i32 = arith.constant 0 : i32
    %c0_i32_0 = arith.constant 0 : i32
    %c0_i32_1 = arith.constant 0 : i32
    return %c0_i32, %c0_i32_0 : i32, i32
  }
  func.func @transform_3(%arg0: i32) -> (i32, i32) {
    %c0_i32 = arith.constant 0 : i32
    %c0_i32_0 = arith.constant 0 : i32
    %c0_i32_1 = arith.constant 0 : i32
    return %c0_i32, %c0_i32_0 : i32, i32
  }
  func.func @transform_4(%arg0: i32) -> (i32, i32) {
    %c0_i32 = arith.constant 0 : i32
    %c0_i32_0 = arith.constant 0 : i32
    %c0_i32_1 = arith.constant 0 : i32
    return %c0_i32, %c0_i32_0 : i32, i32
  }
  func.func @transform_5(%arg0: i32) -> (i32, i32) {
    %c0_i32 = arith.constant 0 : i32
    %c0_i32_0 = arith.constant 0 : i32
    return %arg0, %c0_i32 : i32, i32
  }
}

</mosaic_0001>

<bundles_post_ra>
// kernel: tpu_custom_call.1
= control target key start
LH: loop header
LB: loop body
LE: loop exit
PB: predicated region body
PF: predicated region fallthrough
CT: control target
= control target key end

     0   :  { %10 = vsyncpa [#allocation3], 0  ;;  %s622_s0 = inlined_call_operand.hbm [shape: f32[64,128], index: 0, kind: input, shape index: {}]   ;;  %s623_s1 = inlined_call_operand.hbm [shape: f32[128,128], index: 1, kind: input, shape index: {}]   ;;  %s624_s2 = inlined_call_operand.vmem [shape: f32[1,128], index: 2, kind: input, shape index: {}]   ;;  %s625_s3 = inlined_call_operand.hbm [shape: f32[128,128], index: 3, kind: input, shape index: {}]   ;;  %s626_s4 = inlined_call_operand.vmem [shape: f32[1,128], index: 4, kind: input, shape index: {}]   ;;  %s627_s5 = inlined_call_operand.hbm [shape: f32[64,128], index: 5, kind: output, shape index: {}]  }
   0x1   :  { %11 = vsyncpa [#allocation6], 0 }
   0x2   :  { %12 = vsyncpa [#allocation4], 0  ;;  %s30_s20 = sshll.u32 %s623_s1, 4  ;;  %s496_s21 = smov [#allocation5]   ;;  %s31_s20 = int_to_ptr.hbm [resolvable:$true] %s30_s20 }
   0x3   :  { %s32_s22 = sshll.u32 %s496_s21, 4  ;;  %s17_s25 = sshll.u32 %s622_s0, 4  ;;  %s33_s22 = int_to_ptr.vmem [resolvable:$true] %s32_s22  ;;  %s18_s25 = int_to_ptr.hbm [resolvable:$true] %s17_s25 }
   0x4   :  { %s497_s26 = smov 128   ;;  %s498_s27 = smov 8  }
   0x5   :  { %38 = dma.hbm_to_vmem [thread:$0]  %s31_s20, 2048, %s33_s22, [#allocation6], %s497_s26, %s497_s26, %s498_s27  }
   0x6   :  { %s499_s28 = smov [#allocation2]   ;;  %s45_s1 = sshll.u32 %s625_s3, 4  ;;  %s46_s1 = int_to_ptr.hbm [resolvable:$true] %s45_s1 }
   0x7   :  { %s19_s29 = sshll.u32 %s499_s28, 4  ;;  %s500_s0 = smov [#allocation7]   ;;  %s20_s29 = int_to_ptr.vmem [resolvable:$true] %s19_s29 }
   0x8   :  { %25 = dma.hbm_to_vmem [thread:$0]  %s18_s25, 1024, %s20_s29, [#allocation3], %s497_s26, %s497_s26, %s498_s27  }
   0x9   :  { %s47_s7 = sshll.u32 %s500_s0, 4  ;;  %s48_s7 = int_to_ptr.vmem [resolvable:$true] %s47_s7 }
   0xa   :  { %53 = dma.hbm_to_vmem [thread:$0]  %s46_s1, 2048, %s48_s7, [#allocation6], %s497_s26, %s497_s26, %s498_s27  }
   0xb   :  { %490 = dma.done.wait [#allocation3], 1024  }
   0xc   :  { %491 = vsyncadd [#allocation3], 4294966272 }
   0xd   :  { %492 = dma.done.wait [#allocation6], 4096  }
   0xe   :  { %493 = vsyncadd [#allocation6], 4294963200  ;;  %v91_v0 = vld [vmem:[#allocation5 + $0x78] sm:$0xff]  ;;  %v90_v1 = vld [vmem:[#allocation5 + $0x70] sm:$0xff]  ;;  %s308_s13 = sshll.u32 %s627_s5, 4  ;;  %s309_s13 = int_to_ptr.hbm [resolvable:$true] %s308_s13 }
   0xf   :  { %96 = vmatpush.msra.mxu0 %v91_v0  ;;  %322 = vmatpush.msra.mxu2 %v91_v0  ;;  %v89_v2 = vld [vmem:[#allocation5 + $0x68] sm:$0xff]  ;;  %v88_v3 = vld [vmem:[#allocation5 + $0x60] sm:$0xff]  ;;  %v87_v4 = vld [vmem:[#allocation5 + $0x58] sm:$0xff] }
  0x10   :  { %v86_v5 = vld [vmem:[#allocation5 + $0x50] sm:$0xff]  ;;  %v85_v6 = vld [vmem:[#allocation5 + $0x48] sm:$0xff]  ;;  %v84_v7 = vld [vmem:[#allocation5 + $0x40] sm:$0xff] }
  0x11   :  { %97 = vmatpush.msra.mxu0 %v90_v1  ;;  %323 = vmatpush.msra.mxu2 %v90_v1  ;;  %v83_v8 = vld [vmem:[#allocation5 + $0x38] sm:$0xff]  ;;  %v82_v9 = vld [vmem:[#allocation5 + $0x30] sm:$0xff]  ;;  %v81_v10 = vld [vmem:[#allocation5 + $0x28] sm:$0xff] }
  0x12   :  { %v80_v11 = vld [vmem:[#allocation5 + $0x20] sm:$0xff]  ;;  %v79_v12 = vld [vmem:[#allocation5 + $0x18] sm:$0xff]  ;;  %v78_v13 = vld [vmem:[#allocation5 + $0x10] sm:$0xff] }
  0x13   :  { %98 = vmatpush.msra.mxu0 %v89_v2  ;;  %324 = vmatpush.msra.mxu2 %v89_v2  ;;  %v160_v14 = vld [vmem:[#allocation7 + $0x78] sm:$0xff]  ;;  %v159_v15 = vld [vmem:[#allocation7 + $0x70] sm:$0xff]  ;;  %v77_v16 = vld [vmem:[#allocation5 + $0x8] sm:$0xff] }
  0x14   :  { %165 = vmatpush.msra.mxu1 %v160_v14  ;;  %338 = vmatpush.msra.mxu3 %v160_v14  ;;  %v158_v17 = vld [vmem:[#allocation7 + $0x68] sm:$0xff]  ;;  %v76_v18 = vld [vmem:[#allocation5] sm:$0xff]  ;;  %v156_v22 = vld [vmem:[#allocation7 + $0x58] sm:$0xff] }
  0x15   :  { %99 = vmatpush.msra.mxu0 %v88_v3  ;;  %325 = vmatpush.msra.mxu2 %v88_v3  ;;  %v68_v19 = vld [vmem:[#allocation2] sm:$0xff]  ;;  %v155_v23 = vld [vmem:[#allocation7 + $0x50] sm:$0xff]  ;;  %v154_v24 = vld [vmem:[#allocation7 + $0x48] sm:$0xff] }
  0x16   :  { %166 = vmatpush.msra.mxu1 %v159_v15  ;;  %339 = vmatpush.msra.mxu3 %v159_v15  ;;  %v72_v20 = vld [vmem:[#allocation2 + $0x20] sm:$0xff]  ;;  %v69_v25 = vld [vmem:[#allocation2 + $0x8] sm:$0xff]  ;;  %v152_v28 = vld [vmem:[#allocation7 + $0x38] sm:$0xff] }
  0x17   :  { %100 = vmatpush.msra.mxu0 %v87_v4  ;;  %326 = vmatpush.msra.mxu2 %v87_v4  ;;  %v157_v21 = vld [vmem:[#allocation7 + $0x60] sm:$0xff]  ;;  %v73_v26 = vld [vmem:[#allocation2 + $0x28] sm:$0xff]  ;;  %v151_v29 = vld [vmem:[#allocation7 + $0x30] sm:$0xff] }
  0x18   :  { %167 = vmatpush.msra.mxu1 %v158_v17  ;;  %340 = vmatpush.msra.mxu3 %v158_v17  ;;  %v153_v27 = vld [vmem:[#allocation7 + $0x40] sm:$0xff]  ;;  %v150_v30 = vld [vmem:[#allocation7 + $0x28] sm:$0xff]  ;;  %v70_v31 = vld [vmem:[#allocation2 + $0x10] sm:$0xff] }
  0x19   :  { %101 = vmatpush.msra.mxu0 %v86_v5  ;;  %327 = vmatpush.msra.mxu2 %v86_v5  ;;  %v74_v32 = vld [vmem:[#allocation2 + $0x30] sm:$0xff]  ;;  %v149_v33 = vld [vmem:[#allocation7 + $0x20] sm:$0xff]  ;;  %v148_v34 = vld [vmem:[#allocation7 + $0x18] sm:$0xff] }
  0x1a   :  { %168 = vmatpush.msra.mxu1 %v157_v21  ;;  %341 = vmatpush.msra.mxu3 %v157_v21  ;;  %v71_v35 = vld [vmem:[#allocation2 + $0x18] sm:$0xff]  ;;  %v147_v37 = vld [vmem:[#allocation7 + $0x10] sm:$0xff]  ;;  %v146_v38 = vld [vmem:[#allocation7 + $0x8] sm:$0xff] }
  0x1b   :  { %102 = vmatpush.msra.mxu0 %v85_v6  ;;  %328 = vmatpush.msra.mxu2 %v85_v6  ;;  %v75_v36 = vld [vmem:[#allocation2 + $0x38] sm:$0xff]  ;;  %v145_v39 = vld [vmem:[#allocation7] sm:$0xff] }
  0x1c   :  { %169 = vmatpush.msra.mxu1 %v156_v22  ;;  %342 = vmatpush.msra.mxu3 %v156_v22  ;;  %v360_v40 = vld [vmem:[%s624_s2] ss:$0 sm:$0xff] }
  0x1d   :  { %103 = vmatpush.msra.mxu0 %v84_v7  ;;  %329 = vmatpush.msra.mxu2 %v84_v7  ;;  %v361_v1 = vld [vmem:[%s626_s4] ss:$0 sm:$0xff]  ;;  %s501_s4 = smov [#allocation8]  }
  0x1e   :  { %170 = vmatpush.msra.mxu1 %v155_v23  ;;  %343 = vmatpush.msra.mxu3 %v155_v23  ;;  %s306_s10 = sshll.u32 %s501_s4, 4  ;;  %s307_s10 = int_to_ptr.vmem [resolvable:$true] %s306_s10 }
  0x1f   :  { %104 = vmatpush.msra.mxu0 %v83_v8  ;;  %330 = vmatpush.msra.mxu2 %v83_v8 }
  0x20   :  { %171 = vmatpush.msra.mxu1 %v154_v24  ;;  %344 = vmatpush.msra.mxu3 %v154_v24 }
  0x21   :  { %105 = vmatpush.msra.mxu0 %v82_v9  ;;  %331 = vmatpush.msra.mxu2 %v82_v9 }
  0x22   :  { %172 = vmatpush.msra.mxu1 %v153_v27  ;;  %345 = vmatpush.msra.mxu3 %v153_v27 }
  0x23   :  { %106 = vmatpush.msra.mxu0 %v81_v10  ;;  %332 = vmatpush.msra.mxu2 %v81_v10 }
  0x24   :  { %173 = vmatpush.msra.mxu1 %v152_v28  ;;  %346 = vmatpush.msra.mxu3 %v152_v28 }
  0x25   :  { %107 = vmatpush.msra.mxu0 %v80_v11  ;;  %333 = vmatpush.msra.mxu2 %v80_v11 }
  0x26   :  { %174 = vmatpush.msra.mxu1 %v151_v29  ;;  %347 = vmatpush.msra.mxu3 %v151_v29 }
  0x27   :  { %108 = vmatpush.msra.mxu0 %v79_v12  ;;  %334 = vmatpush.msra.mxu2 %v79_v12 }
  0x28   :  { %175 = vmatpush.msra.mxu1 %v150_v30  ;;  %348 = vmatpush.msra.mxu3 %v150_v30 }
  0x29   :  { %109 = vmatpush.msra.mxu0 %v78_v13  ;;  %335 = vmatpush.msra.mxu2 %v78_v13 }
  0x2a   :  { %176 = vmatpush.msra.mxu1 %v149_v33  ;;  %349 = vmatpush.msra.mxu3 %v149_v33 }
  0x2b   :  { %110 = vmatpush.msra.mxu0 %v77_v16  ;;  %336 = vmatpush.msra.mxu2 %v77_v16 }
  0x2c   :  { %177 = vmatpush.msra.mxu1 %v148_v34  ;;  %350 = vmatpush.msra.mxu3 %v148_v34 }
  0x2d   :  { %111 = vmatpush.msra.mxu0 %v76_v18  ;;  %337 = vmatpush.msra.mxu2 %v76_v18 }
  0x2e   :  { %112 = vmatmul.f32.vlgmr.msra.gmra.mxu0 %v68_v19  ;;  %124 = vmatmul.f32.vlgmr.msra.gmra.mxu2 %v72_v20 }
  0x2f   :  { %178 = vmatpush.msra.mxu1 %v147_v37  ;;  %351 = vmatpush.msra.mxu3 %v147_v37 }
  0x31   :  { %179 = vmatpush.msra.mxu1 %v146_v38  ;;  %352 = vmatpush.msra.mxu3 %v146_v38 }
  0x33   :  { %180 = vmatpush.msra.mxu1 %v145_v39  ;;  %353 = vmatpush.msra.mxu3 %v145_v39 }
  0x36   :  { %115 = vmatmul.f32.gmra.mxu0 %v69_v25  ;;  %127 = vmatmul.f32.gmra.mxu2 %v73_v26 }
  0x3e   :  { %118 = vmatmul.f32.gmra.mxu0 %v70_v31  ;;  %130 = vmatmul.f32.gmra.mxu2 %v74_v32 }
  0x46   :  { %121 = vmatmul.f32.gmra.mxu0 %v71_v35  ;;  %133 = vmatmul.f32.gmra.mxu2 %v75_v36 }
  0xab   :  { %v113_v41 = vpop.f32.mrf.mxu0 }
  0xac   :  { %v114_v42 = vadd.f32 %v360_v40, %v113_v41 }
  0xae   :  { %v137_v43 = vmax.f32 %v114_v42, 0.0 }
  0xb0   :  { %181 = vmatmul.f32.vlgmr.msra.gmra.mxu1 %v137_v43 }
  0xb1   :  { %v125_v44 = vpop.f32.mrf.mxu2 }
  0xb2   :  { %v126_v45 = vadd.f32 %v360_v40, %v125_v44 }
  0xb3   :  { %v116_v46 = vpop.f32.mrf.mxu0 }
  0xb4   :  { %v141_v47 = vmax.f32 %v126_v45, 0.0  ;;  %v117_v48 = vadd.f32 %v360_v40, %v116_v46 }
  0xb6   :  { %v138_v49 = vmax.f32 %v117_v48, 0.0  ;;  %193 = vmatmul.f32.vlgmr.msra.gmra.mxu3 %v141_v47 }
  0xb8   :  { %184 = vmatmul.f32.gmra.mxu1 %v138_v49 }
  0xb9   :  { %v128_v50 = vpop.f32.mrf.mxu2 }
  0xba   :  { %v129_v51 = vadd.f32 %v360_v40, %v128_v50 }
  0xbb   :  { %v119_v52 = vpop.f32.mrf.mxu0 }
  0xbc   :  { %v142_v53 = vmax.f32 %v129_v51, 0.0  ;;  %v120_v54 = vadd.f32 %v360_v40, %v119_v52 }
  0xbe   :  { %v139_v55 = vmax.f32 %v120_v54, 0.0  ;;  %196 = vmatmul.f32.gmra.mxu3 %v142_v53 }
  0xc0   :  { %187 = vmatmul.f32.gmra.mxu1 %v139_v55 }
  0xc1   :  { %v131_v56 = vpop.f32.mrf.mxu2 }
  0xc2   :  { %v132_v57 = vadd.f32 %v360_v40, %v131_v56 }
  0xc3   :  { %v122_v58 = vpop.f32.mrf.mxu0 }
  0xc4   :  { %v143_v59 = vmax.f32 %v132_v57, 0.0  ;;  %v123_v60 = vadd.f32 %v360_v40, %v122_v58 }
  0xc6   :  { %v140_v61 = vmax.f32 %v123_v60, 0.0  ;;  %199 = vmatmul.f32.gmra.mxu3 %v143_v59 }
  0xc8   :  { %190 = vmatmul.f32.gmra.mxu1 %v140_v61 }
  0xc9   :  { %v134_v62 = vpop.f32.mrf.mxu2 }
  0xca   :  { %v135_v63 = vadd.f32 %v360_v40, %v134_v62 }
  0xcc   :  { %v144_v0 = vmax.f32 %v135_v63, 0.0 }
  0xce   :  { %202 = vmatmul.f32.gmra.mxu3 %v144_v0 }
 0x12d   :  { %v182_v2 = vpop.f32.mrf.mxu1 }
 0x12e   :  { %v556_v3 = vadd.f32 %v361_v1, %v182_v2 }
 0x130   :  { %206 = vmax.xlane.f32.xlu0 %v556_v3 }
 0x135   :  { %v185_v4 = vpop.f32.mrf.mxu1 }
 0x136   :  { %v559_v5 = vadd.f32 %v361_v1, %v185_v4 }
 0x138   :  { %208 = vmax.xlane.f32.xlu0 %v559_v5 }
 0x139   :  { %v194_v6 = vpop.f32.mrf.mxu3 }
 0x13a   :  { %v562_v7 = vadd.f32 %v361_v1, %v194_v6 }
 0x13c   :  { %214 = vmax.xlane.f32.xlu2 %v562_v7 }
 0x13d   :  { %v188_v8 = vpop.f32.mrf.mxu1 }
 0x13e   :  { %v565_v9 = vadd.f32 %v361_v1, %v188_v8 }
 0x140   :  { %210 = vmax.xlane.f32.xlu1 %v565_v9 }
 0x141   :  { %v197_v10 = vpop.f32.mrf.mxu3 }
 0x142   :  { %v568_v11 = vadd.f32 %v361_v1, %v197_v10 }
 0x144   :  { %216 = vmax.xlane.f32.xlu2 %v568_v11 }
 0x145   :  { %v191_v12 = vpop.f32.mrf.mxu1 }
 0x146   :  { %v571_v13 = vadd.f32 %v361_v1, %v191_v12 }
 0x148   :  { %212 = vmax.xlane.f32.xlu1 %v571_v13 }
 0x149   :  { %v200_v14 = vpop.f32.mrf.mxu3 }
 0x14a   :  { %v574_v15 = vadd.f32 %v361_v1, %v200_v14 }
 0x14c   :  { %218 = vmax.xlane.f32.xlu0 %v574_v15 }
 0x151   :  { %v203_v16 = vpop.f32.mrf.mxu3 }
 0x152   :  { %v577_v17 = vadd.f32 %v361_v1, %v203_v16 }
 0x154   :  { %220 = vmax.xlane.f32.xlu1 %v577_v17 }
 0x1a3   :  { %v207_v18 = vpop.xlane.xlu0 %206 }
 0x1a4   :  { %v222_v19 = vsub.f32 %v556_v3, %v207_v18 }
 0x1a6   :  { %v230_v20 = vmul.f32 1.442695, %v222_v19 }
 0x1a8   :  { %362 = vpow2.f32 %v230_v20 }
 0x1ab   :  { %v209_v21 = vpop.xlane.xlu0 %208 }
 0x1ac   :  { %v223_v22 = vsub.f32 %v559_v5, %v209_v21 }
 0x1ae   :  { %v363_v23 = vpop.eup %362  ;;  %v232_v24 = vmul.f32 1.442695, %v223_v22 }
 0x1af   :  { %v582_v25 = vpop.xlane.xlu2 %214  ;;  %246 = vadd.xlane.f32.xlu2 %v363_v23 }
 0x1b0   :  { %364 = vpow2.f32 %v232_v24  ;;  %v226_v26 = vsub.f32 %v562_v7, %v582_v25 }
 0x1b2   :  { %v238_v27 = vmul.f32 1.442695, %v226_v26 }
 0x1b3   :  { %v211_v28 = vpop.xlane.xlu1 %210 }
 0x1b4   :  { %v224_v29 = vsub.f32 %v565_v9, %v211_v28  ;;  %366 = vpow2.f32 %v238_v27 }
 0x1b6   :  { %v365_v30 = vpop.eup %364  ;;  %v234_v31 = vmul.f32 1.442695, %v224_v29 }
 0x1b7   :  { %v587_v32 = vpop.xlane.xlu2 %216  ;;  %248 = vadd.xlane.f32.xlu0 %v365_v30 }
 0x1b8   :  { %368 = vpow2.f32 %v234_v31  ;;  %v227_v33 = vsub.f32 %v568_v11, %v587_v32 }
 0x1ba   :  { %v240_v34 = vmul.f32 1.442695, %v227_v33  ;;  %v367_v37 = vpop.eup %366 }
 0x1bb   :  { %v591_v35 = vpop.xlane.xlu1 %212 }
 0x1bc   :  { %v225_v36 = vsub.f32 %v571_v13, %v591_v35  ;;  %370 = vpow2.f32 %v240_v34 }
 0x1be   :  { %v369_v38 = vpop.eup %368  ;;  %v236_v39 = vmul.f32 1.442695, %v225_v36 }
 0x1bf   :  { %250 = vadd.xlane.f32.xlu1 %v369_v38  ;;  %254 = vadd.xlane.f32.xlu0 %v367_v37  ;;  %v595_v40 = vpop.xlane.xlu0 %218 }
 0x1c0   :  { %372 = vpow2.f32 %v236_v39  ;;  %v228_v41 = vsub.f32 %v574_v15, %v595_v40 }
 0x1c2   :  { %v242_v42 = vmul.f32 1.442695, %v228_v41  ;;  %v371_v43 = vpop.eup %370 }
 0x1c4   :  { %374 = vpow2.f32 %v242_v42 }
 0x1c6   :  { %v373_v44 = vpop.eup %372 }
 0x1c7   :  { %256 = vadd.xlane.f32.xlu1 %v371_v43  ;;  %v599_v45 = vpop.xlane.xlu1 %220  ;;  %252 = vadd.xlane.f32.xlu2 %v373_v44 }
 0x1c8   :  { %v229_v46 = vsub.f32 %v577_v17, %v599_v45 }
 0x1ca   :  { %v244_v47 = vmul.f32 1.442695, %v229_v46  ;;  %v375_v48 = vpop.eup %374 }
 0x1cc   :  { %376 = vpow2.f32 %v244_v47 }
 0x1cf   :  { %258 = vadd.xlane.f32.xlu2 %v375_v48 }
 0x1d2   :  { %v377_v49 = vpop.eup %376 }
 0x1d3   :  { %260 = vadd.xlane.f32.xlu0 %v377_v49 }
 0x222   :  { %v247_v50 = vpop.xlane.xlu2 %246 }
 0x223   :  { %378 = vlog2.f32 %v247_v50 }
 0x229   :  { %v379_v51 = vpop.eup %378 }
 0x22a   :  { %v263_v52 = vmul.f32 0.6931472, %v379_v51  ;;  %v249_v53 = vpop.xlane.xlu0 %248 }
 0x22b   :  { %380 = vlog2.f32 %v249_v53 }
 0x22c   :  { %v278_v54 = vadd.f32 %v263_v52, %v207_v18 }
 0x22e   :  { %v286_v55 = vsub.f32 %v556_v3, %v278_v54 }
 0x230   :  { %294 = vst [vmem:[#allocation8] sm:$0xff] %v286_v55 }
 0x231   :  { %v381_v56 = vpop.eup %380 }
 0x232   :  { %v265_v57 = vmul.f32 0.6931472, %v381_v56  ;;  %v251_v58 = vpop.xlane.xlu1 %250  ;;  %v255_v59 = vpop.xlane.xlu0 %254 }
 0x233   :  { %382 = vlog2.f32 %v251_v58 }
 0x234   :  { %v279_v60 = vadd.f32 %v265_v57, %v209_v21  ;;  %384 = vlog2.f32 %v255_v59 }
 0x236   :  { %v287_v61 = vsub.f32 %v559_v5, %v279_v60 }
 0x238   :  { %295 = vst [vmem:[#allocation8 + $0x8] sm:$0xff] %v287_v61 }
 0x239   :  { %v383_v62 = vpop.eup %382 }
 0x23a   :  { %v385_v63 = vpop.eup %384  ;;  %v267_v0 = vmul.f32 0.6931472, %v383_v62  ;;  %v257_v1 = vpop.xlane.xlu1 %256 }
 0x23b   :  { %v253_v2 = vpop.xlane.xlu2 %252  ;;  %v271_v4 = vmul.f32 0.6931472, %v385_v63  ;;  %386 = vlog2.f32 %v257_v1 }
 0x23c   :  { %v280_v6 = vadd.f32 %v267_v0, %v211_v28  ;;  %388 = vlog2.f32 %v253_v2 }
 0x23d   :  { %v282_v3 = vadd.f32 %v271_v4, %v582_v25 }
 0x23e   :  { %v288_v8 = vsub.f32 %v565_v9, %v280_v6 }
 0x23f   :  { %v290_v10 = vsub.f32 %v562_v7, %v282_v3 }
 0x240   :  { %296 = vst [vmem:[#allocation8 + $0x10] sm:$0xff] %v288_v8 }
 0x241   :  { %v387_v12 = vpop.eup %386  ;;  %298 = vst [vmem:[#allocation8 + $0x20] sm:$0xff] %v290_v10 }
 0x242   :  { %v389_v5 = vpop.eup %388  ;;  %v273_v14 = vmul.f32 0.6931472, %v387_v12 }
 0x243   :  { %v259_v16 = vpop.xlane.xlu2 %258  ;;  %v269_v18 = vmul.f32 0.6931472, %v389_v5 }
 0x244   :  { %390 = vlog2.f32 %v259_v16  ;;  %v283_v19 = vadd.f32 %v273_v14, %v587_v32 }
 0x245   :  { %v281_v20 = vadd.f32 %v269_v18, %v591_v35 }
 0x246   :  { %v291_v21 = vsub.f32 %v568_v11, %v283_v19  ;;  %v261_v22 = vpop.xlane.xlu0 %260 }
 0x247   :  { %v289_v23 = vsub.f32 %v571_v13, %v281_v20  ;;  %392 = vlog2.f32 %v261_v22 }
 0x248   :  { %299 = vst [vmem:[#allocation8 + $0x28] sm:$0xff] %v291_v21 }
 0x249   :  { %297 = vst [vmem:[#allocation8 + $0x18] sm:$0xff] %v289_v23 }
 0x24a   :  { %v391_v7 = vpop.eup %390 }
 0x24b   :  { %v275_v9 = vmul.f32 0.6931472, %v391_v7 }
 0x24d   :  { %v284_v24 = vadd.f32 %v275_v9, %v595_v40  ;;  %v393_v25 = vpop.eup %392 }
 0x24e   :  { %v277_v27 = vmul.f32 0.6931472, %v393_v25 }
 0x24f   :  { %v292_v26 = vsub.f32 %v574_v15, %v284_v24 }
 0x250   :  { %v285_v11 = vadd.f32 %v277_v27, %v599_v45 }
 0x251   :  { %300 = vst [vmem:[#allocation8 + $0x30] sm:$0xff] %v292_v26 }
 0x252   :  { %v293_v13 = vsub.f32 %v577_v17, %v285_v11 }
 0x254   :  { %301 = vst [vmem:[#allocation8 + $0x38] sm:$0xff] %v293_v13 }
 0x255   :  { %314 = dma.vmem_to_hbm [thread:$0]  %s307_s10, 1024, %s309_s13, [#allocation4], %s497_s26, %s497_s26, %s498_s27  }
 0x256   :  { %494 = dma.done.wait [#allocation4], 1024  }
 0x257   :  { %495 = vsyncadd [#allocation4], 4294966272 }
 0x258   :  { %319 = vsyncpa [#allocation3], 1 }
 0x259   :  { %320 = vsyncpa [#allocation6], 1 }
 0x25a   :  { %321 = vsyncpa [#allocation4], 1 }

</bundles_post_ra>
